<compile_context>
chip_gen: v7x
topology: tpu7x:2x2x1
jax: 0.10.0
libtpu: 0.0.40
codegen_flags: <defaults>
</compile_context>

<pallas_src>
import math

import jax
import jax.numpy as jnp
from jax.experimental import pallas as pl
from jax.experimental.pallas import tpu as pltpu

_LN_10000 = math.log(10000.0)
_HALF_PI = 0.5 * math.pi


# ---------------------------------------------------------------------------
# host-side reference table (exact PyTorch __init__ recipe); also used as the
# fallback buffer when in-kernel sin/cos generation is unavailable.
# ---------------------------------------------------------------------------
def _make_encoding_table(embed_dim, num_rows, dtype=jnp.float32):
    pos = jnp.arange(num_rows, dtype=jnp.float32)
    inv_freq = 1.0 / (10000.0 ** (jnp.arange(0.0, embed_dim, 2.0, dtype=jnp.float32) / embed_dim))
    args = pos[:, None] * inv_freq[None, :]
    enc = jnp.zeros((num_rows, embed_dim), jnp.float32)
    enc = enc.at[:, 0::2].set(jnp.sin(args))
    enc = enc.at[:, 1::2].set(jnp.cos(args))
    return enc.astype(dtype)


def _round_up(x, m):
    return ((x + m - 1) // m) * m


def _sublane_quantum(dtype):
    return {4: 8, 2: 16, 1: 32}[jnp.dtype(dtype).itemsize]


def _block_rows(length, embed_dim, dtype, target_block_bytes):
    """Rows per grid step: ~target_block_bytes per tile (amortizes the ~0.35 us
    per-step overhead), but never much more than the requested length so HBM
    traffic stays proportional to `length` for short sequences."""
    q = _sublane_quantum(dtype)
    itemsize = jnp.dtype(dtype).itemsize
    rows = max(q, (target_block_bytes // (embed_dim * itemsize)) // q * q)
    return min(rows, _round_up(length, q))


# ---------------------------------------------------------------------------
# kernels
# ---------------------------------------------------------------------------
def _posenc_generate_kernel(o_ref):
    """Write-only: o[p, c] = sin(pos(p) * inv_freq(c) + (pi/2 if c is odd))."""
    bm, d = o_ref.shape
    # Column-dependent terms on a (1, d) row -> EUP exp cost is O(d), not O(bm*d).
    col = jax.lax.broadcasted_iota(jnp.int32, (1, d), 1)
    exponent = jnp.bitwise_and(col, -2).astype(jnp.float32) * (1.0 / d)   # 2*(c//2)/d
    inv_freq = jnp.exp((-_LN_10000) * exponent)                           # 10000 ** -exponent
    phase = jnp.bitwise_and(col, 1).astype(jnp.float32) * _HALF_PI        # cos(x) == sin(x + pi/2)
    # Absolute position of every row in this block.
    pos = (jax.lax.broadcasted_iota(jnp.int32, (bm, d), 0)
           + pl.program_id(0) * bm).astype(jnp.float32)
    o_ref[...] = jnp.sin(pos * inv_freq + phase).astype(o_ref.dtype)


def _posenc_copy_kernel(table_ref, o_ref):
    o_ref[...] = table_ref[...]


# ---------------------------------------------------------------------------
# forward paths
# ---------------------------------------------------------------------------
def _forward_generate(embed_dim, dtype, target_block_bytes, length):
    br = _block_rows(length, embed_dim, dtype, target_block_bytes)
    return pl.pallas_call(
        _posenc_generate_kernel,
        out_shape=jax.ShapeDtypeStruct((length, embed_dim), dtype),
        grid=(pl.cdiv(length, br),),
        out_specs=pl.BlockSpec((br, embed_dim), lambda i: (i, 0)),
        compiler_params=pltpu.CompilerParams(dimension_semantics=("parallel",)),
    )()


def _forward_copy(table, embed_dim, dtype, target_block_bytes, length):
    br = _block_rows(length, embed_dim, dtype, target_block_bytes)
    return pl.pallas_call(
        _posenc_copy_kernel,
        out_shape=jax.ShapeDtypeStruct((length, embed_dim), dtype),
        grid=(pl.cdiv(length, br),),
        in_specs=[pl.BlockSpec((br, embed_dim), lambda i: (i, 0))],
        out_specs=pl.BlockSpec((br, embed_dim), lambda i: (i, 0)),
        compiler_params=pltpu.CompilerParams(dimension_semantics=("parallel",)),
    )(table)


# ---------------------------------------------------------------------------
# module equivalent
# ---------------------------------------------------------------------------
def init_positional_encoder(embed_dim, max_len=10000, dtype=jnp.float32,
                            target_block_bytes=1 << 20):
    assert embed_dim % 2 == 0, "embed_dim must be even (sin/cos interleave)"
    dtype = jnp.dtype(dtype)
    state = dict(embed_dim=embed_dim, max_len=max_len, dtype=dtype,
                 target_block_bytes=int(target_block_bytes))
    # Probe the write-only generator once; if Mosaic can't lower (or botches)
    # in-kernel sin/exp on this backend, keep the original precomputed buffer.
    probe_len = min(max_len, 64)
    try:
        probe = _forward_generate(embed_dim, dtype, state["target_block_bytes"], probe_len)
        jax.block_until_ready(probe)
        ref = _make_encoding_table(embed_dim, probe_len, dtype)
        if not jnp.allclose(probe.astype(jnp.float32), ref.astype(jnp.float32),
                            atol=1e-2, rtol=0.0):
            raise ValueError("in-kernel sin/cos numerics out of tolerance")
        state["mode"] = "generate"
        state["table"] = None
    except Exception:  # fallback: exact PyTorch-style precomputed buffer + copy kernel
        state["mode"] = "copy"
        rows = _round_up(max_len, _sublane_quantum(dtype))
        state["table"] = _make_encoding_table(embed_dim, rows, dtype)
    return state


def positional_encoder_forward(state, length):
    """Equivalent of PositionalEncoder.forward(len): returns (length, embed_dim)."""
    length = int(length)
    assert 0 < length <= state["max_len"]
    if state["mode"] == "generate":
        return _forward_generate(state["embed_dim"], state["dtype"],
                                 state["target_block_bytes"], length)
    return _forward_copy(state["table"], state["embed_dim"], state["dtype"],
                         state["target_block_bytes"], length)


# ---------------------------------------------------------------------------
if __name__ == "__main__":
    key = jax.random.PRNGKey(0)
    k1, k2 = jax.random.split(key)

    # config 1: embed_dim = 32 (narrower than one 128-lane vreg), max_len = 10000
    D1, MAXLEN1 = 32, 10000
    st1 = init_positional_encoder(D1, max_len=MAXLEN1)
    n1 = int(jax.random.randint(k1, (), 1, 257))        # deterministic from PRNGKey(0)
    out1 = positional_encoder_forward(st1, n1)
    jax.block_until_ready(out1)
    tab1 = _make_encoding_table(D1, MAXLEN1)
    assert out1.shape == (n1, D1) and out1.dtype == jnp.float32
    err1 = float(jnp.max(jnp.abs(out1 - tab1[:n1])))
    assert err1 <= 2e-3, err1

    # tiny length exercising a partial (non multiple-of-8) edge block
    out1b = positional_encoder_forward(st1, 5)
    jax.block_until_ready(out1b)
    assert out1b.shape == (5, D1)
    err1b = float(jnp.max(jnp.abs(out1b - tab1[:5])))
    assert err1b <= 2e-3, err1b

    # config 2: embed_dim = 128 (exactly lane-dense), max_len = 2048
    D2, MAXLEN2 = 128, 2048
    st2 = init_positional_encoder(D2, max_len=MAXLEN2)
    n2 = int(jax.random.randint(k2, (), 1, 200))
    out2 = positional_encoder_forward(st2, n2)
    jax.block_until_ready(out2)
    tab2 = _make_encoding_table(D2, MAXLEN2)
    assert out2.shape == (n2, D2)
    err2 = float(jnp.max(jnp.abs(out2 - tab2[:n2])))
    assert err2 <= 2e-3, err2

    print("KERNEL_OK")
</pallas_src>

<mosaic_0001>
module attributes {stable_mosaic.version = 11 : i64} {
  func.func @_posenc_copy_kernel(%arg0: i32, %arg1: memref<176x32xf32, #tpu.memory_space<vmem>>, %arg2: memref<176x32xf32, #tpu.memory_space<vmem>>) attributes {dimension_semantics = [#tpu.dimension_semantics<parallel>], iteration_bounds = array<i64: 1>, scalar_prefetch = 0 : i64, scratch_operands = 0 : i64, tpu.core_type = #tpu.core_type<tc>, window_params = [{transform_indices = @transform_0, window_bounds = array<i64: 176, 32>}, {transform_indices = @transform_1, window_bounds = array<i64: 176, 32>}]} {
    %c0 = arith.constant 0 : index
    %c0_0 = arith.constant 0 : index
    %0 = vector.load %arg1[%c0, %c0_0] : memref<176x32xf32, #tpu.memory_space<vmem>>, vector<176x32xf32>
    %c0_1 = arith.constant 0 : index
    %c0_2 = arith.constant 0 : index
    %1 = vector.load %arg2[%c0_1, %c0_2] : memref<176x32xf32, #tpu.memory_space<vmem>>, vector<176x32xf32>
    tpu.vector_store %arg2[%c0_1, %c0_2], %0 {strides = array<i32>} : memref<176x32xf32, #tpu.memory_space<vmem>>, vector<176x32xf32>,
    return
  }
  func.func @transform_0(%arg0: i32) -> (i32, i32) {
    %c0_i32 = arith.constant 0 : i32
    %c0_i32_0 = arith.constant 0 : i32
    return %arg0, %c0_i32 : i32, i32
  }
  func.func @transform_1(%arg0: i32) -> (i32, i32) {
    %c0_i32 = arith.constant 0 : i32
    %c0_i32_0 = arith.constant 0 : i32
    return %arg0, %c0_i32 : i32, i32
  }
}

</mosaic_0001>

<bundles_post_ra>
// kernel: tpu_custom_call.1
= control target key start
LH: loop header
LB: loop body
LE: loop exit
PB: predicated region body
PF: predicated region fallthrough
CT: control target
= control target key end

     0   :  { %vm30_vm0 = vcmask 261120   ;;  %s221_s0 = inlined_call_operand.vmem [shape: f32[10000,32], index: 0, kind: input, shape index: {}]   ;;  %s222_s1 = inlined_call_operand.vmem [shape: f32[176,32], index: 1, kind: output, shape index: {}]  }
   0x1   :  { %v8_v0 = vld [vmem:[%s221_s0] sm:$0xff]  ;;  %v9_v1 = vld [vmem:[%s221_s0 + $0x8] sm:$0xff]  ;;  %v10_v2 = vld [vmem:[%s221_s0 + $0x10] sm:$0xff] }
   0x2   :  { %31 = vst.msk [vmem:[%s222_s1] sm:$0xff] %vm30_vm0, %v8_v0  ;;  %32 = vst.msk [vmem:[%s222_s1 + $0x8] sm:$0xff] %vm30_vm0, %v9_v1  ;;  %v11_v3 = vld [vmem:[%s221_s0 + $0x18] sm:$0xff]  ;;  %v12_v4 = vld [vmem:[%s221_s0 + $0x20] sm:$0xff] }
   0x3   :  { %33 = vst.msk [vmem:[%s222_s1 + $0x10] sm:$0xff] %vm30_vm0, %v10_v2  ;;  %v13_v5 = vld [vmem:[%s221_s0 + $0x28] sm:$0xff]  ;;  %34 = vst.msk [vmem:[%s222_s1 + $0x18] sm:$0xff] %vm30_vm0, %v11_v3  ;;  %v14_v6 = vld [vmem:[%s221_s0 + $0x30] sm:$0xff] }
   0x4   :  { %35 = vst.msk [vmem:[%s222_s1 + $0x20] sm:$0xff] %vm30_vm0, %v12_v4  ;;  %36 = vst.msk [vmem:[%s222_s1 + $0x28] sm:$0xff] %vm30_vm0, %v13_v5  ;;  %v15_v7 = vld [vmem:[%s221_s0 + $0x38] sm:$0xff]  ;;  %v16_v8 = vld [vmem:[%s221_s0 + $0x40] sm:$0xff] }
   0x5   :  { %37 = vst.msk [vmem:[%s222_s1 + $0x30] sm:$0xff] %vm30_vm0, %v14_v6  ;;  %38 = vst.msk [vmem:[%s222_s1 + $0x38] sm:$0xff] %vm30_vm0, %v15_v7  ;;  %v17_v9 = vld [vmem:[%s221_s0 + $0x48] sm:$0xff]  ;;  %v18_v10 = vld [vmem:[%s221_s0 + $0x50] sm:$0xff] }
   0x6   :  { %39 = vst.msk [vmem:[%s222_s1 + $0x40] sm:$0xff] %vm30_vm0, %v16_v8  ;;  %v19_v11 = vld [vmem:[%s221_s0 + $0x58] sm:$0xff]  ;;  %40 = vst.msk [vmem:[%s222_s1 + $0x48] sm:$0xff] %vm30_vm0, %v17_v9  ;;  %v20_v12 = vld [vmem:[%s221_s0 + $0x60] sm:$0xff] }
   0x7   :  { %41 = vst.msk [vmem:[%s222_s1 + $0x50] sm:$0xff] %vm30_vm0, %v18_v10  ;;  %42 = vst.msk [vmem:[%s222_s1 + $0x58] sm:$0xff] %vm30_vm0, %v19_v11  ;;  %v21_v13 = vld [vmem:[%s221_s0 + $0x68] sm:$0xff]  ;;  %v22_v14 = vld [vmem:[%s221_s0 + $0x70] sm:$0xff] }
   0x8   :  { %43 = vst.msk [vmem:[%s222_s1 + $0x60] sm:$0xff] %vm30_vm0, %v20_v12  ;;  %44 = vst.msk [vmem:[%s222_s1 + $0x68] sm:$0xff] %vm30_vm0, %v21_v13  ;;  %v23_v15 = vld [vmem:[%s221_s0 + $0x78] sm:$0xff]  ;;  %v24_v16 = vld [vmem:[%s221_s0 + $0x80] sm:$0xff] }
   0x9   :  { %45 = vst.msk [vmem:[%s222_s1 + $0x70] sm:$0xff] %vm30_vm0, %v22_v14  ;;  %v25_v17 = vld [vmem:[%s221_s0 + $0x88] sm:$0xff]  ;;  %46 = vst.msk [vmem:[%s222_s1 + $0x78] sm:$0xff] %vm30_vm0, %v23_v15  ;;  %v26_v18 = vld [vmem:[%s221_s0 + $0x90] sm:$0xff] }
   0xa   :  { %47 = vst.msk [vmem:[%s222_s1 + $0x80] sm:$0xff] %vm30_vm0, %v24_v16  ;;  %48 = vst.msk [vmem:[%s222_s1 + $0x88] sm:$0xff] %vm30_vm0, %v25_v17  ;;  %v27_v19 = vld [vmem:[%s221_s0 + $0x98] sm:$0xff]  ;;  %v28_v20 = vld [vmem:[%s221_s0 + $0xa0] sm:$0xff] }
   0xb   :  { %49 = vst.msk [vmem:[%s222_s1 + $0x90] sm:$0xff] %vm30_vm0, %v26_v18  ;;  %50 = vst.msk [vmem:[%s222_s1 + $0x98] sm:$0xff] %vm30_vm0, %v27_v19  ;;  %v29_v21 = vld [vmem:[%s221_s0 + $0xa8] sm:$0xff] }
   0xc   :  { %51 = vst.msk [vmem:[%s222_s1 + $0xa0] sm:$0xff] %vm30_vm0, %v28_v20  ;;  %52 = vst.msk [vmem:[%s222_s1 + $0xa8] sm:$0xff] %vm30_vm0, %v29_v21 }

</bundles_post_ra>
